<compile_context>
chip_gen: v7x
topology: tpu7x:2x2x1
jax: 0.10.0
libtpu: 0.0.40
codegen_flags: <defaults>
</compile_context>

<pallas_src>
import functools

import jax
import jax.numpy as jnp
from jax.experimental import pallas as pl
from jax.experimental.pallas import tpu as pltpu

INPUT_SIZE = 6 * 4     # 24
HIDDEN_SIZE = 32
OUTPUT_NUM = 10
BATCH = 2
SEQ = 8


def rnn_kernel(x_ref, params_ref, out_ref, *,
               seq_len, block_b, hidden, din_pad, out_num):
    """1-layer LSTM over time (one batch block), last hidden -> Linear -> softmax.

    All parameters arrive as ONE packed (rows, 4H) VMEM block (single DMA):
      rows [0, din_pad)             : w_ih   (zero-padded feature rows)
      rows [din_pad, din_pad+H)     : w_hh
      rows [din_pad+H, din_pad+2H)  : w_fc   (lanes >= out_num are zero)
      row   din_pad+2H              : b = b_ih + b_hh
      row   din_pad+2H+1            : b_fc   (lanes >= out_num are zero)
    All row slices below are 8-sublane aligned -> no tile-crossing copies.
    """
    H = hidden
    T = seq_len
    Bb = block_b

    x = x_ref[0]                                               # (T*Bb, din_pad) time-major
    w_ih = params_ref[0:din_pad, :]                            # (din_pad, 4H)
    w_hh = params_ref[din_pad:din_pad + H, :]                  # (H, 4H)
    w_fc = params_ref[din_pad + H:din_pad + 2 * H, :]          # (H, 4H), lanes>=out_num zero
    b = params_ref[din_pad + 2 * H:din_pad + 2 * H + 1, :]     # (1, 4H)
    b_fc = params_ref[din_pad + 2 * H + 1:din_pad + 2 * H + 2, :]  # (1, 4H)

    # Hoisted input projection: one MXU pass over all T steps, off the serial
    # recurrence critical path.
    gates_x = jnp.dot(x, w_ih, preferred_element_type=jnp.float32) + b   # (T*Bb, 4H)

    h = jnp.zeros((Bb, H), jnp.float32)
    c = jnp.zeros((Bb, H), jnp.float32)

    # T is small and static: fully unrolled so every per-step slice is a static,
    # 8-sublane-aligned row window and the scheduler sees across iterations.
    for t in range(T):
        gates = gates_x[t * Bb:(t + 1) * Bb, :] \
            + jnp.dot(h, w_hh, preferred_element_type=jnp.float32)        # (Bb, 4H)
        # Two full-vreg transcendentals (EUP); gate quarters are cheap lane slices.
        sig = jax.nn.sigmoid(gates)
        tnh = jnp.tanh(gates)
        i_g = sig[:, 0 * H:1 * H]
        f_g = sig[:, 1 * H:2 * H]
        g_g = tnh[:, 2 * H:3 * H]
        o_g = sig[:, 3 * H:4 * H]
        c = f_g * c + i_g * g_g
        h = o_g * jnp.tanh(c)

    # Lane-dense final projection: padded w_fc/b_fc lanes are zero; mask them to
    # -inf before softmax so they contribute nothing and store exactly 0.
    logits = jnp.dot(h, w_fc, preferred_element_type=jnp.float32) + b_fc  # (Bb, 4H)
    lane = jax.lax.broadcasted_iota(jnp.int32, logits.shape, 1)
    logits = jnp.where(lane < out_num, logits, -jnp.inf)
    m = jnp.max(logits, axis=1, keepdims=True)
    e = jnp.exp(logits - m)
    # Exact division (not approx reciprocal) to match the f32 reference.
    out_ref[0] = e / jnp.sum(e, axis=1, keepdims=True)   # lane-dense (Bb, 4H) store


def rnn_forward(x, w_ih, w_hh, b, w_fc, b_fc, *, block_b=None):
    B, T, Din = x.shape
    H = w_hh.shape[0]
    G = 4 * H
    out_num = w_fc.shape[1]
    assert out_num <= G, "output width must fit in the 4H-lane output block"

    # Pad feature dim to a multiple of 8 so packed-weight row slices are 8-aligned.
    din_pad = -(-Din // 8) * 8

    # Pad batch to a multiple of 8 sublanes.
    b_pad = -(-B // 8) * 8
    if block_b is None:
        # 256 fills the v6e/v7x MXU rows; v5e's 128-wide MXU simply takes 2 passes.
        block_b = min(b_pad, 256)
        # VMEM guard: keep the hoisted (T*block_b, 4H) f32 gates buffer modest.
        while block_b > 8 and T * block_b * G * 4 > (8 << 20):
            block_b = max(8, (block_b // 2) // 8 * 8)
    if b_pad % block_b:
        b_pad = -(-b_pad // block_b) * block_b
    nb = b_pad // block_b

    # Inputs, padded and laid out time-major within each batch block:
    # row t*block_b + j of block i is time step t of batch row i*block_b + j.
    x_p = jnp.zeros((b_pad, T, din_pad), jnp.float32).at[:B, :, :Din].set(x)
    x_r = (x_p.reshape(nb, block_b, T, din_pad)
              .transpose(0, 2, 1, 3)
              .reshape(nb, T * block_b, din_pad))

    # Single packed parameter block (one BlockSpec, one DMA).
    n_rows = -(-(din_pad + 2 * H + 2) // 8) * 8
    params = jnp.zeros((n_rows, G), jnp.float32)
    params = params.at[:Din, :].set(w_ih)
    params = params.at[din_pad:din_pad + H, :].set(w_hh)
    params = params.at[din_pad + H:din_pad + 2 * H, :out_num].set(w_fc)
    params = params.at[din_pad + 2 * H, :].set(b.reshape(-1))
    params = params.at[din_pad + 2 * H + 1, :out_num].set(b_fc.reshape(-1))

    kernel = functools.partial(rnn_kernel, seq_len=T, block_b=block_b,
                               hidden=H, din_pad=din_pad, out_num=out_num)

    out = pl.pallas_call(
        kernel,
        out_shape=jax.ShapeDtypeStruct((nb, block_b, G), jnp.float32),
        grid_spec=pltpu.PrefetchScalarGridSpec(
            num_scalar_prefetch=0,
            grid=(nb,),
            in_specs=[
                pl.BlockSpec((1, T * block_b, din_pad), lambda i: (i, 0, 0)),
                # Packed weights: constant block index -> VMEM-resident across
                # batch-block grid steps (one DMA total, never re-fetched).
                pl.BlockSpec((n_rows, G), lambda i: (0, 0)),
            ],
            # Lane-dense 4H-wide output (unmasked vst); real logits live in
            # lanes [0, out_num) and are sliced off in the wrapper.
            out_specs=pl.BlockSpec((1, block_b, G), lambda i: (i, 0, 0)),
        ),
        compiler_params=pltpu.CompilerParams(
            # Batch blocks are independent -> shard across TCs on v7x megacore;
            # neutral on single-TC v5e/v6e.
            dimension_semantics=("parallel",),
        ),
    )(x_r, params)

    return out.reshape(b_pad, G)[:B, :out_num]


def reference_forward(x, w_ih, w_hh, b, w_fc, b_fc):
    """Pure-JAX reference for the same math (PyTorch LSTM semantics)."""
    B, T, _ = x.shape
    H = w_hh.shape[0]
    h = jnp.zeros((B, H), jnp.float32)
    c = jnp.zeros((B, H), jnp.float32)
    for t in range(T):
        gates = x[:, t, :] @ w_ih + h @ w_hh + b
        i = jax.nn.sigmoid(gates[:, 0 * H:1 * H])
        f = jax.nn.sigmoid(gates[:, 1 * H:2 * H])
        g = jnp.tanh(gates[:, 2 * H:3 * H])
        o = jax.nn.sigmoid(gates[:, 3 * H:4 * H])
        c = f * c + i * g
        h = o * jnp.tanh(c)
    logits = h @ w_fc + b_fc
    return jax.nn.softmax(logits, axis=1)


if __name__ == "__main__":
    key = jax.random.PRNGKey(0)
    kx, k1, k2, k3, k4, k5, k6 = jax.random.split(key, 7)

    # PyTorch-style init: U(-1/sqrt(H), 1/sqrt(H)), deterministic here.
    bound = 1.0 / (HIDDEN_SIZE ** 0.5)

    x = jax.random.normal(kx, (BATCH, SEQ, INPUT_SIZE), dtype=jnp.float32)

    w_ih = jax.random.uniform(k1, (INPUT_SIZE, 4 * HIDDEN_SIZE),
                              minval=-bound, maxval=bound, dtype=jnp.float32)
    w_hh = jax.random.uniform(k2, (HIDDEN_SIZE, 4 * HIDDEN_SIZE),
                              minval=-bound, maxval=bound, dtype=jnp.float32)
    b_ih = jax.random.uniform(k3, (4 * HIDDEN_SIZE,),
                              minval=-bound, maxval=bound, dtype=jnp.float32)
    b_hh = jax.random.uniform(k4, (4 * HIDDEN_SIZE,),
                              minval=-bound, maxval=bound, dtype=jnp.float32)
    b = (b_ih + b_hh).reshape(1, 4 * HIDDEN_SIZE)

    fc_bound = 1.0 / (HIDDEN_SIZE ** 0.5)
    w_fc = jax.random.uniform(k5, (HIDDEN_SIZE, OUTPUT_NUM),
                              minval=-fc_bound, maxval=fc_bound, dtype=jnp.float32)
    b_fc = jax.random.uniform(k6, (1, OUTPUT_NUM),
                              minval=-fc_bound, maxval=fc_bound, dtype=jnp.float32)

    out = rnn_forward(x, w_ih, w_hh, b, w_fc, b_fc)
    out = jax.block_until_ready(out)

    ref = reference_forward(x, w_ih, w_hh, b, w_fc, b_fc)
    assert out.shape == (BATCH, OUTPUT_NUM)
    assert jnp.allclose(out, ref, atol=1e-4, rtol=1e-4), "mismatch vs JAX reference"
    assert jnp.allclose(jnp.sum(out, axis=1), 1.0, atol=1e-5), "softmax rows must sum to 1"

    print("KERNEL_OK")
</pallas_src>

<mosaic_0001>
module attributes {stable_mosaic.version = 11 : i64} {
  func.func @rnn_kernel(%arg0: i32, %arg1: memref<1x64x24xf32, #tpu.memory_space<vmem>>, %arg2: memref<96x128xf32, #tpu.memory_space<vmem>>, %arg3: memref<1x8x128xf32, #tpu.memory_space<vmem>>) attributes {dimension_semantics = [#tpu.dimension_semantics<parallel>], iteration_bounds = array<i64: 1>, scalar_prefetch = 0 : i64, scratch_operands = 0 : i64, tpu.core_type = #tpu.core_type<tc>, window_params = [{transform_indices = @transform_0, window_bounds = array<i64: 1, 64, 24>}, {pipeline_mode = #tpu.pipeline_mode<synchronous>, transform_indices = @transform_1, window_bounds = array<i64: 96, 128>}, {transform_indices = @transform_2, window_bounds = array<i64: 1, 8, 128>}]} {
    %c0 = arith.constant 0 : index
    %c0_0 = arith.constant 0 : index
    %c0_1 = arith.constant 0 : index
    %0 = vector.load %arg1[%c0, %c0_0, %c0_1] : memref<1x64x24xf32, #tpu.memory_space<vmem>>, vector<1x64x24xf32>
    %1 = vector.shape_cast %0 : vector<1x64x24xf32> to vector<64x24xf32>
    %c0_2 = arith.constant 0 : index
    %c0_3 = arith.constant 0 : index
    %2 = vector.load %arg2[%c0_2, %c0_3] : memref<96x128xf32, #tpu.memory_space<vmem>>, vector<24x128xf32>
    %c24 = arith.constant 24 : index
    %c0_4 = arith.constant 0 : index
    %3 = vector.load %arg2[%c24, %c0_4] : memref<96x128xf32, #tpu.memory_space<vmem>>, vector<32x128xf32>
    %c56 = arith.constant 56 : index
    %c0_5 = arith.constant 0 : index
    %4 = vector.load %arg2[%c56, %c0_5] : memref<96x128xf32, #tpu.memory_space<vmem>>, vector<32x128xf32>
    %c88 = arith.constant 88 : index
    %c0_6 = arith.constant 0 : index
    %5 = vector.load %arg2[%c88, %c0_6] : memref<96x128xf32, #tpu.memory_space<vmem>>, vector<1x128xf32>
    %c89 = arith.constant 89 : index
    %c0_7 = arith.constant 0 : index
    %6 = vector.load %arg2[%c89, %c0_7] : memref<96x128xf32, #tpu.memory_space<vmem>>, vector<1x128xf32>
    %cst = arith.constant dense<0.000000e+00> : vector<64x128xf32>
    %7 = tpu.matmul %1, %2, %cst {dimension_numbers = #tpu.dot_dimension_numbers<[1], [0], [0], [1], [0, 0, 1, 1], [], []>} : vector<64x24xf32>, vector<24x128xf32>, vector<64x128xf32> -> vector<64x128xf32>
    %8 = vector.broadcast %5 : vector<1x128xf32> to vector<64x128xf32>
    %9 = arith.addf %7, %8 : vector<64x128xf32>
    %cst_8 = arith.constant 0.000000e+00 : f32
    %10 = vector.broadcast %cst_8 : f32 to vector<8x32xf32>
    %cst_9 = arith.constant 0.000000e+00 : f32
    %11 = vector.broadcast %cst_9 : f32 to vector<8x32xf32>
    %12 = vector.extract_strided_slice %9 {offsets = [0, 0], sizes = [8, 128], strides = [1, 1]} : vector<64x128xf32> to vector<8x128xf32>
    %cst_10 = arith.constant dense<0.000000e+00> : vector<8x128xf32>
    %13 = tpu.matmul %10, %3, %cst_10 {dimension_numbers = #tpu.dot_dimension_numbers<[1], [0], [0], [1], [0, 0, 1, 1], [], []>} : vector<8x32xf32>, vector<32x128xf32>, vector<8x128xf32> -> vector<8x128xf32>
    %14 = arith.addf %12, %13 : vector<8x128xf32>
    %15 = arith.negf %14 : vector<8x128xf32>
    %16 = math.exp %15 : vector<8x128xf32>
    %cst_11 = arith.constant 1.000000e+00 : f32
    %17 = vector.broadcast %cst_11 : f32 to vector<8x128xf32>
    %18 = arith.addf %17, %16 : vector<8x128xf32>
    %19 = arith.divf %17, %18 : vector<8x128xf32>
    %20 = math.tanh %14 : vector<8x128xf32>
    %21 = vector.extract_strided_slice %19 {offsets = [0, 0], sizes = [8, 32], strides = [1, 1]} : vector<8x128xf32> to vector<8x32xf32>
    %22 = vector.extract_strided_slice %19 {offsets = [0, 32], sizes = [8, 32], strides = [1, 1]} : vector<8x128xf32> to vector<8x32xf32>
    %23 = vector.extract_strided_slice %20 {offsets = [0, 64], sizes = [8, 32], strides = [1, 1]} : vector<8x128xf32> to vector<8x32xf32>
    %24 = vector.extract_strided_slice %19 {offsets = [0, 96], sizes = [8, 32], strides = [1, 1]} : vector<8x128xf32> to vector<8x32xf32>
    %25 = arith.mulf %22, %11 : vector<8x32xf32>
    %26 = arith.mulf %21, %23 : vector<8x32xf32>
    %27 = arith.addf %25, %26 : vector<8x32xf32>
    %28 = math.tanh %27 : vector<8x32xf32>
    %29 = arith.mulf %24, %28 : vector<8x32xf32>
    %30 = vector.extract_strided_slice %9 {offsets = [8, 0], sizes = [8, 128], strides = [1, 1]} : vector<64x128xf32> to vector<8x128xf32>
    %cst_12 = arith.constant dense<0.000000e+00> : vector<8x128xf32>
    %31 = tpu.matmul %29, %3, %cst_12 {dimension_numbers = #tpu.dot_dimension_numbers<[1], [0], [0], [1], [0, 0, 1, 1], [], []>} : vector<8x32xf32>, vector<32x128xf32>, vector<8x128xf32> -> vector<8x128xf32>
    %32 = arith.addf %30, %31 : vector<8x128xf32>
    %33 = arith.negf %32 : vector<8x128xf32>
    %34 = math.exp %33 : vector<8x128xf32>
    %cst_13 = arith.constant 1.000000e+00 : f32
    %35 = vector.broadcast %cst_13 : f32 to vector<8x128xf32>
    %36 = arith.addf %35, %34 : vector<8x128xf32>
    %37 = arith.divf %35, %36 : vector<8x128xf32>
    %38 = math.tanh %32 : vector<8x128xf32>
    %39 = vector.extract_strided_slice %37 {offsets = [0, 0], sizes = [8, 32], strides = [1, 1]} : vector<8x128xf32> to vector<8x32xf32>
    %40 = vector.extract_strided_slice %37 {offsets = [0, 32], sizes = [8, 32], strides = [1, 1]} : vector<8x128xf32> to vector<8x32xf32>
    %41 = vector.extract_strided_slice %38 {offsets = [0, 64], sizes = [8, 32], strides = [1, 1]} : vector<8x128xf32> to vector<8x32xf32>
    %42 = vector.extract_strided_slice %37 {offsets = [0, 96], sizes = [8, 32], strides = [1, 1]} : vector<8x128xf32> to vector<8x32xf32>
    %43 = arith.mulf %40, %27 : vector<8x32xf32>
    %44 = arith.mulf %39, %41 : vector<8x32xf32>
    %45 = arith.addf %43, %44 : vector<8x32xf32>
    %46 = math.tanh %45 : vector<8x32xf32>
    %47 = arith.mulf %42, %46 : vector<8x32xf32>
    %48 = vector.extract_strided_slice %9 {offsets = [16, 0], sizes = [8, 128], strides = [1, 1]} : vector<64x128xf32> to vector<8x128xf32>
    %cst_14 = arith.constant dense<0.000000e+00> : vector<8x128xf32>
    %49 = tpu.matmul %47, %3, %cst_14 {dimension_numbers = #tpu.dot_dimension_numbers<[1], [0], [0], [1], [0, 0, 1, 1], [], []>} : vector<8x32xf32>, vector<32x128xf32>, vector<8x128xf32> -> vector<8x128xf32>
    %50 = arith.addf %48, %49 : vector<8x128xf32>
    %51 = arith.negf %50 : vector<8x128xf32>
    %52 = math.exp %51 : vector<8x128xf32>
    %cst_15 = arith.constant 1.000000e+00 : f32
    %53 = vector.broadcast %cst_15 : f32 to vector<8x128xf32>
    %54 = arith.addf %53, %52 : vector<8x128xf32>
    %55 = arith.divf %53, %54 : vector<8x128xf32>
    %56 = math.tanh %50 : vector<8x128xf32>
    %57 = vector.extract_strided_slice %55 {offsets = [0, 0], sizes = [8, 32], strides = [1, 1]} : vector<8x128xf32> to vector<8x32xf32>
    %58 = vector.extract_strided_slice %55 {offsets = [0, 32], sizes = [8, 32], strides = [1, 1]} : vector<8x128xf32> to vector<8x32xf32>
    %59 = vector.extract_strided_slice %56 {offsets = [0, 64], sizes = [8, 32], strides = [1, 1]} : vector<8x128xf32> to vector<8x32xf32>
    %60 = vector.extract_strided_slice %55 {offsets = [0, 96], sizes = [8, 32], strides = [1, 1]} : vector<8x128xf32> to vector<8x32xf32>
    %61 = arith.mulf %58, %45 : vector<8x32xf32>
    %62 = arith.mulf %57, %59 : vector<8x32xf32>
    %63 = arith.addf %61, %62 : vector<8x32xf32>
    %64 = math.tanh %63 : vector<8x32xf32>
    %65 = arith.mulf %60, %64 : vector<8x32xf32>
    %66 = vector.extract_strided_slice %9 {offsets = [24, 0], sizes = [8, 128], strides = [1, 1]} : vector<64x128xf32> to vector<8x128xf32>
    %cst_16 = arith.constant dense<0.000000e+00> : vector<8x128xf32>
    %67 = tpu.matmul %65, %3, %cst_16 {dimension_numbers = #tpu.dot_dimension_numbers<[1], [0], [0], [1], [0, 0, 1, 1], [], []>} : vector<8x32xf32>, vector<32x128xf32>, vector<8x128xf32> -> vector<8x128xf32>
    %68 = arith.addf %66, %67 : vector<8x128xf32>
    %69 = arith.negf %68 : vector<8x128xf32>
    %70 = math.exp %69 : vector<8x128xf32>
    %cst_17 = arith.constant 1.000000e+00 : f32
    %71 = vector.broadcast %cst_17 : f32 to vector<8x128xf32>
    %72 = arith.addf %71, %70 : vector<8x128xf32>
    %73 = arith.divf %71, %72 : vector<8x128xf32>
    %74 = math.tanh %68 : vector<8x128xf32>
    %75 = vector.extract_strided_slice %73 {offsets = [0, 0], sizes = [8, 32], strides = [1, 1]} : vector<8x128xf32> to vector<8x32xf32>
    %76 = vector.extract_strided_slice %73 {offsets = [0, 32], sizes = [8, 32], strides = [1, 1]} : vector<8x128xf32> to vector<8x32xf32>
    %77 = vector.extract_strided_slice %74 {offsets = [0, 64], sizes = [8, 32], strides = [1, 1]} : vector<8x128xf32> to vector<8x32xf32>
    %78 = vector.extract_strided_slice %73 {offsets = [0, 96], sizes = [8, 32], strides = [1, 1]} : vector<8x128xf32> to vector<8x32xf32>
    %79 = arith.mulf %76, %63 : vector<8x32xf32>
    %80 = arith.mulf %75, %77 : vector<8x32xf32>
    %81 = arith.addf %79, %80 : vector<8x32xf32>
    %82 = math.tanh %81 : vector<8x32xf32>
    %83 = arith.mulf %78, %82 : vector<8x32xf32>
    %84 = vector.extract_strided_slice %9 {offsets = [32, 0], sizes = [8, 128], strides = [1, 1]} : vector<64x128xf32> to vector<8x128xf32>
    %cst_18 = arith.constant dense<0.000000e+00> : vector<8x128xf32>
    %85 = tpu.matmul %83, %3, %cst_18 {dimension_numbers = #tpu.dot_dimension_numbers<[1], [0], [0], [1], [0, 0, 1, 1], [], []>} : vector<8x32xf32>, vector<32x128xf32>, vector<8x128xf32> -> vector<8x128xf32>
    %86 = arith.addf %84, %85 : vector<8x128xf32>
    %87 = arith.negf %86 : vector<8x128xf32>
    %88 = math.exp %87 : vector<8x128xf32>
    %cst_19 = arith.constant 1.000000e+00 : f32
    %89 = vector.broadcast %cst_19 : f32 to vector<8x128xf32>
    %90 = arith.addf %89, %88 : vector<8x128xf32>
    %91 = arith.divf %89, %90 : vector<8x128xf32>
    %92 = math.tanh %86 : vector<8x128xf32>
    %93 = vector.extract_strided_slice %91 {offsets = [0, 0], sizes = [8, 32], strides = [1, 1]} : vector<8x128xf32> to vector<8x32xf32>
    %94 = vector.extract_strided_slice %91 {offsets = [0, 32], sizes = [8, 32], strides = [1, 1]} : vector<8x128xf32> to vector<8x32xf32>
    %95 = vector.extract_strided_slice %92 {offsets = [0, 64], sizes = [8, 32], strides = [1, 1]} : vector<8x128xf32> to vector<8x32xf32>
    %96 = vector.extract_strided_slice %91 {offsets = [0, 96], sizes = [8, 32], strides = [1, 1]} : vector<8x128xf32> to vector<8x32xf32>
    %97 = arith.mulf %94, %81 : vector<8x32xf32>
    %98 = arith.mulf %93, %95 : vector<8x32xf32>
    %99 = arith.addf %97, %98 : vector<8x32xf32>
    %100 = math.tanh %99 : vector<8x32xf32>
    %101 = arith.mulf %96, %100 : vector<8x32xf32>
    %102 = vector.extract_strided_slice %9 {offsets = [40, 0], sizes = [8, 128], strides = [1, 1]} : vector<64x128xf32> to vector<8x128xf32>
    %cst_20 = arith.constant dense<0.000000e+00> : vector<8x128xf32>
    %103 = tpu.matmul %101, %3, %cst_20 {dimension_numbers = #tpu.dot_dimension_numbers<[1], [0], [0], [1], [0, 0, 1, 1], [], []>} : vector<8x32xf32>, vector<32x128xf32>, vector<8x128xf32> -> vector<8x128xf32>
    %104 = arith.addf %102, %103 : vector<8x128xf32>
    %105 = arith.negf %104 : vector<8x128xf32>
    %106 = math.exp %105 : vector<8x128xf32>
    %cst_21 = arith.constant 1.000000e+00 : f32
    %107 = vector.broadcast %cst_21 : f32 to vector<8x128xf32>
    %108 = arith.addf %107, %106 : vector<8x128xf32>
    %109 = arith.divf %107, %108 : vector<8x128xf32>
    %110 = math.tanh %104 : vector<8x128xf32>
    %111 = vector.extract_strided_slice %109 {offsets = [0, 0], sizes = [8, 32], strides = [1, 1]} : vector<8x128xf32> to vector<8x32xf32>
    %112 = vector.extract_strided_slice %109 {offsets = [0, 32], sizes = [8, 32], strides = [1, 1]} : vector<8x128xf32> to vector<8x32xf32>
    %113 = vector.extract_strided_slice %110 {offsets = [0, 64], sizes = [8, 32], strides = [1, 1]} : vector<8x128xf32> to vector<8x32xf32>
    %114 = vector.extract_strided_slice %109 {offsets = [0, 96], sizes = [8, 32], strides = [1, 1]} : vector<8x128xf32> to vector<8x32xf32>
    %115 = arith.mulf %112, %99 : vector<8x32xf32>
    %116 = arith.mulf %111, %113 : vector<8x32xf32>
    %117 = arith.addf %115, %116 : vector<8x32xf32>
    %118 = math.tanh %117 : vector<8x32xf32>
    %119 = arith.mulf %114, %118 : vector<8x32xf32>
    %120 = vector.extract_strided_slice %9 {offsets = [48, 0], sizes = [8, 128], strides = [1, 1]} : vector<64x128xf32> to vector<8x128xf32>
    %cst_22 = arith.constant dense<0.000000e+00> : vector<8x128xf32>
    %121 = tpu.matmul %119, %3, %cst_22 {dimension_numbers = #tpu.dot_dimension_numbers<[1], [0], [0], [1], [0, 0, 1, 1], [], []>} : vector<8x32xf32>, vector<32x128xf32>, vector<8x128xf32> -> vector<8x128xf32>
    %122 = arith.addf %120, %121 : vector<8x128xf32>
    %123 = arith.negf %122 : vector<8x128xf32>
    %124 = math.exp %123 : vector<8x128xf32>
    %cst_23 = arith.constant 1.000000e+00 : f32
    %125 = vector.broadcast %cst_23 : f32 to vector<8x128xf32>
    %126 = arith.addf %125, %124 : vector<8x128xf32>
    %127 = arith.divf %125, %126 : vector<8x128xf32>
    %128 = math.tanh %122 : vector<8x128xf32>
    %129 = vector.extract_strided_slice %127 {offsets = [0, 0], sizes = [8, 32], strides = [1, 1]} : vector<8x128xf32> to vector<8x32xf32>
    %130 = vector.extract_strided_slice %127 {offsets = [0, 32], sizes = [8, 32], strides = [1, 1]} : vector<8x128xf32> to vector<8x32xf32>
    %131 = vector.extract_strided_slice %128 {offsets = [0, 64], sizes = [8, 32], strides = [1, 1]} : vector<8x128xf32> to vector<8x32xf32>
    %132 = vector.extract_strided_slice %127 {offsets = [0, 96], sizes = [8, 32], strides = [1, 1]} : vector<8x128xf32> to vector<8x32xf32>
    %133 = arith.mulf %130, %117 : vector<8x32xf32>
    %134 = arith.mulf %129, %131 : vector<8x32xf32>
    %135 = arith.addf %133, %134 : vector<8x32xf32>
    %136 = math.tanh %135 : vector<8x32xf32>
    %137 = arith.mulf %132, %136 : vector<8x32xf32>
    %138 = vector.extract_strided_slice %9 {offsets = [56, 0], sizes = [8, 128], strides = [1, 1]} : vector<64x128xf32> to vector<8x128xf32>
    %cst_24 = arith.constant dense<0.000000e+00> : vector<8x128xf32>
    %139 = tpu.matmul %137, %3, %cst_24 {dimension_numbers = #tpu.dot_dimension_numbers<[1], [0], [0], [1], [0, 0, 1, 1], [], []>} : vector<8x32xf32>, vector<32x128xf32>, vector<8x128xf32> -> vector<8x128xf32>
    %140 = arith.addf %138, %139 : vector<8x128xf32>
    %141 = arith.negf %140 : vector<8x128xf32>
    %142 = math.exp %141 : vector<8x128xf32>
    %cst_25 = arith.constant 1.000000e+00 : f32
    %143 = vector.broadcast %cst_25 : f32 to vector<8x128xf32>
    %144 = arith.addf %143, %142 : vector<8x128xf32>
    %145 = arith.divf %143, %144 : vector<8x128xf32>
    %146 = math.tanh %140 : vector<8x128xf32>
    %147 = vector.extract_strided_slice %145 {offsets = [0, 0], sizes = [8, 32], strides = [1, 1]} : vector<8x128xf32> to vector<8x32xf32>
    %148 = vector.extract_strided_slice %145 {offsets = [0, 32], sizes = [8, 32], strides = [1, 1]} : vector<8x128xf32> to vector<8x32xf32>
    %149 = vector.extract_strided_slice %146 {offsets = [0, 64], sizes = [8, 32], strides = [1, 1]} : vector<8x128xf32> to vector<8x32xf32>
    %150 = vector.extract_strided_slice %145 {offsets = [0, 96], sizes = [8, 32], strides = [1, 1]} : vector<8x128xf32> to vector<8x32xf32>
    %151 = arith.mulf %148, %135 : vector<8x32xf32>
    %152 = arith.mulf %147, %149 : vector<8x32xf32>
    %153 = arith.addf %151, %152 : vector<8x32xf32>
    %154 = math.tanh %153 : vector<8x32xf32>
    %155 = arith.mulf %150, %154 : vector<8x32xf32>
    %cst_26 = arith.constant dense<0.000000e+00> : vector<8x128xf32>
    %156 = tpu.matmul %155, %4, %cst_26 {dimension_numbers = #tpu.dot_dimension_numbers<[1], [0], [0], [1], [0, 0, 1, 1], [], []>} : vector<8x32xf32>, vector<32x128xf32>, vector<8x128xf32> -> vector<8x128xf32>
    %157 = vector.broadcast %6 : vector<1x128xf32> to vector<8x128xf32>
    %158 = arith.addf %156, %157 : vector<8x128xf32>
    %159 = tpu.iota {dimensions = array<i32: 1>} : vector<8x128xi32>
    %c10_i32 = arith.constant 10 : i32
    %160 = vector.broadcast %c10_i32 : i32 to vector<8x128xi32>
    %161 = arith.cmpi slt, %159, %160 : vector<8x128xi32>
    %cst_27 = arith.constant 0xFF800000 : f32
    %162 = vector.broadcast %cst_27 : f32 to vector<8x128xf32>
    %163 = arith.select %161, %158, %162 : vector<8x128xi1>, vector<8x128xf32>
    %cst_28 = arith.constant dense<0xFF800000> : vector<8xf32>
    %164 = vector.multi_reduction <maximumf>, %163, %cst_28 [1] : vector<8x128xf32> to vector<8xf32>
    %165 = vector.shape_cast %164 : vector<8xf32> to vector<8x1xf32>
    %166 = vector.broadcast %165 : vector<8x1xf32> to vector<8x128xf32>
    %167 = arith.subf %163, %166 : vector<8x128xf32>
    %168 = math.exp %167 : vector<8x128xf32>
    %cst_29 = arith.constant dense<0.000000e+00> : vector<8xf32>
    %169 = vector.multi_reduction <add>, %168, %cst_29 [1] : vector<8x128xf32> to vector<8xf32>
    %170 = vector.shape_cast %169 : vector<8xf32> to vector<8x1xf32>
    %171 = vector.broadcast %170 : vector<8x1xf32> to vector<8x128xf32>
    %172 = arith.divf %168, %171 : vector<8x128xf32>
    %c0_30 = arith.constant 0 : index
    %c0_31 = arith.constant 0 : index
    %c0_32 = arith.constant 0 : index
    %173 = vector.load %arg3[%c0_30, %c0_31, %c0_32] : memref<1x8x128xf32, #tpu.memory_space<vmem>>, vector<1x8x128xf32>
    %174 = vector.shape_cast %173 : vector<1x8x128xf32> to vector<8x128xf32>
    %175 = vector.shape_cast %172 : vector<8x128xf32> to vector<1x8x128xf32>
    tpu.vector_store %arg3[%c0_30, %c0_31, %c0_32], %175 {strides = array<i32>} : memref<1x8x128xf32, #tpu.memory_space<vmem>>, vector<1x8x128xf32>,
    return
  }
  func.func @transform_0(%arg0: i32) -> (i32, i32, i32) {
    %c0_i32 = arith.constant 0 : i32
    %c0_i32_0 = arith.constant 0 : i32
    %c0_i32_1 = arith.constant 0 : i32
    return %arg0, %c0_i32, %c0_i32_0 : i32, i32, i32
  }
  func.func @transform_1(%arg0: i32) -> (i32, i32) {
    %c0_i32 = arith.constant 0 : i32
    %c0_i32_0 = arith.constant 0 : i32
    %c0_i32_1 = arith.constant 0 : i32
    return %c0_i32, %c0_i32_0 : i32, i32
  }
  func.func @transform_2(%arg0: i32) -> (i32, i32, i32) {
    %c0_i32 = arith.constant 0 : i32
    %c0_i32_0 = arith.constant 0 : i32
    %c0_i32_1 = arith.constant 0 : i32
    return %arg0, %c0_i32, %c0_i32_0 : i32, i32, i32
  }
}

</mosaic_0001>

<bundles_post_ra>
// kernel: tpu_custom_call.1
= control target key start
LH: loop header
LB: loop body
LE: loop exit
PB: predicated region body
PF: predicated region fallthrough
CT: control target
= control target key end

     0   :  { %7 = vsyncpa [#allocation3], 0  ;;  %s1669_s0 = inlined_call_operand.vmem [shape: f32[1,64,24], index: 0, kind: input, shape index: {}]   ;;  %s1670_s1 = inlined_call_operand.hbm [shape: f32[96,128], index: 1, kind: input, shape index: {}]   ;;  %s1671_s2 = inlined_call_operand.hbm [shape: f32[1,8,128], index: 2, kind: output, shape index: {}]  }
   0x1   :  { %8 = vsyncpa [#allocation4], 0  ;;  %s1470_s9 = smov [#allocation2]   ;;  %s1422_s13 = scalar_lea.hbm %s1670_s1, 1536 }
   0x2   :  { %s16_s10 = sshll.u32 %s1470_s9, 4  ;;  %p1423_p0 = scmp.ne.s32.totalorder %s1670_s1, %s1422_s13  ;;  %s17_s10 = int_to_ptr.vmem [resolvable:$true] %s16_s10 }
   0x3   :  { %p1426_p1 = scmp.lt.u32.totalorder %s1422_s13, %s1670_s1 }
   0x5   :  { %p1428_p2 = pnand %p1426_p1, %p1423_p0 }
   0x7   :  { %1431 = shalt.err (!%p1428_p2)
}
   0x8   :  { %s1432_s18 = scalar_lea.vmem %s17_s10, 1536  ;;  %p1437_p4 = scmp.lt.s32.totalorder %s17_s10, %s17_s10 }
   0x9   :  { %p1433_p3 = scmp.ne.s32.totalorder %s17_s10, %s1432_s18  ;;  %p1438_p5 = scmp.lt.s32.totalorder %s1432_s18, %s1432_s18 }
   0xb   :  { %p1439_p6 = por %p1438_p5, %p1437_p4 }
   0xd   :  { %p1440_p7 = pnand %p1439_p6, %p1433_p3 }
   0xf   :  { %1443 = shalt.err (!%p1440_p7)
}
  0x10   :  { %s1471_s19 = smov 128   ;;  %s1472_s20 = smov 8  }
  0x11   :  { %22 = dma.hbm_to_vmem [thread:$0]  %s1670_s1, 1536, %s17_s10, [#allocation3], %s1471_s19, %s1471_s19, %s1472_s20  }
  0x12   :  { %1466 = dma.done.wait [#allocation3], 1536  }
  0x13   :  { %1467 = vsyncadd [#allocation3], 4294965760  ;;  %v1473_v0 = vmov 0.0|0.0   ;;  %vm1474_vm0 = vmmov 0   ;;  %v1475_v1 = vmov 0.0   ;;  %vm51_vm1 = vcmask 195584  }
  0x14   :  { %1291 = vmatprep.subr.bf16.mxu1 %v1473_v0  ;;  %1196 = vmatprep.mubr.msk.f32.mxu1 %vm1474_vm0, %v1475_v1  ;;  %v34_v2 = vld [vmem:[#allocation2] sm:$0xff]  ;;  %v35_v3 = vld [vmem:[#allocation2 + $0x8] sm:$0xff]  ;;  %v37_v4 = vld [vmem:[#allocation2 + $0x18] sm:$0xff]  ;;  %s1476_s26 = smov 64   ;;  %s1477_s27 = smov 32   ;;  %vm181_vm2 = vcmask 261120  }
  0x15   :  { %v1287_v5 = vpack.c.bf16 %v35_v3, %v34_v2  ;;  %v38_v6 = vld [vmem:[#allocation2 + $0x20] sm:$0xff]  ;;  %v36_v9 = vld [vmem:[#allocation2 + $0x10] sm:$0xff]  ;;  %v39_v10 = vld [vmem:[#allocation2 + $0x28] sm:$0xff] }
  0x16   :  { %v26_v7 = vld [vmem:[%s1669_s0] sm:$0xff]  ;;  %v1512_v8 = vpack.c.bf16 %v38_v6, %v37_v4  ;;  %v40_v11 = vld [vmem:[#allocation2 + $0x30] sm:$0xff]  ;;  %v27_v13 = vld [vmem:[%s1669_s0 + $0x8] sm:$0xff] }
  0x17   :  { %1176 = vmatprep.mubr.msk.f32.mxu0 %vm51_vm1, %v26_v7  ;;  %1288 = vmatprep.subr.bf16.mxu0 %v1287_v5  ;;  %v1516_v12 = vpack.c.bf16 %v40_v11, %v39_v10  ;;  %v1537_v14 = vld [vmem:[#allocation2 + $0x58] ss:$0 sm:$0xff]  ;;  %v28_v49 = vld [vmem:[%s1669_s0 + $0x10] sm:$0xff]  ;;  %v30_v51 = vld [vmem:[%s1669_s0 + $0x20] sm:$0xff] }
  0x18   :  { %1290 = vmatpush3.bf16.msra.mxu0 %v1287_v5  ;;  %1293 = vmatpush3.bf16.msra.mxu1 %v1512_v8  ;;  %v29_v50 = vld [vmem:[%s1669_s0 + $0x18] sm:$0xff]  ;;  %v31_v52 = vld [vmem:[%s1669_s0 + $0x28] sm:$0xff]  ;;  %v32_v53 = vld [vmem:[%s1669_s0 + $0x30] sm:$0xff] }
  0x19   :  { %1174 = vmatprep.subr.mxu0 %v36_v9  ;;  %1294 = vmatprep.subr.bf16.mxu1 %v1473_v0  ;;  %v33_v54 = vld [vmem:[%s1669_s0 + $0x38] sm:$0xff]  ;;  %s1478_s0 = smov [#allocation5]  }
  0x1a   :  { %s1079_s12 = sshll.u32 %s1478_s0, 4  ;;  %s1080_s12 = int_to_ptr.vmem [resolvable:$true] %s1079_s12 }
  0x1b   :  { %s1444_s13 = scalar_lea.vmem %s1080_s12, 128  ;;  %p1449_p9 = scmp.lt.s32.totalorder %s1080_s12, %s1080_s12 }
  0x1c   :  { %1175 = vmatpush3.msra.mxu0 %v36_v9  ;;  %1296 = vmatpush3.bf16.msra.mxu1 %v1516_v12  ;;  %p1445_p8 = scmp.ne.s32.totalorder %s1080_s12, %s1444_s13  ;;  %p1450_p10 = scmp.lt.s32.totalorder %s1444_s13, %s1444_s13 }
  0x1d   :  { %1177 = vmatmul.mubr.msk.f32.vlgmr.msra.gmra.mrb[0].mxu0 %vm51_vm1, %v27_v13  ;;  %1297 = vmatprep.subr.bf16.mxu1 %v1473_v0 }
  0x1e   :  { %1303 = vmatprep.subr.bf16.mxu0 %v1473_v0  ;;  %1179 = vmatprep.mubr.msk.f32.mxu0 %vm51_vm1, %v28_v49  ;;  %p1451_p11 = por %p1450_p10, %p1449_p9 }
  0x1f   :  { %1197 = vmatmul.mubr.f32.vlgmr.msra.gmra.mrb[0].mxu1 %v1475_v1  ;;  %1305 = vmatpush3.bf16.msra.mxu0 %v1512_v8 }
  0x20   :  { %1299 = vmatpush3.bf16.msra.mxu1 %v1512_v8  ;;  %1207 = vmatprep.mubr.msk.f32.mxu1 %vm1474_vm0, %v1475_v1  ;;  %p1452_p12 = pnand %p1451_p11, %p1445_p8 }
  0x21   :  { %1300 = vmatprep.subr.bf16.mxu1 %v1473_v0  ;;  %1306 = vmatprep.subr.bf16.mxu0 %v1473_v0 }
  0x22   :  { %1180 = vmatmul.mubr.msk.f32.gmra.mrb[2].mxu0 %vm51_vm1, %v29_v50 }
  0x23   :  { %1308 = vmatpush3.bf16.msra.mxu0 %v1516_v12  ;;  %1182 = vmatprep.mubr.msk.f32.mxu0 %vm51_vm1, %v30_v51 }
  0x24   :  { %1302 = vmatpush3.bf16.msra.mxu1 %v1516_v12  ;;  %1315 = vmatprep.subr.bf16.mxu0 %v1473_v0 }
  0x25   :  { %1309 = vmatprep.subr.bf16.mxu1 %v1473_v0 }
  0x26   :  { %1183 = vmatmul.mubr.msk.f32.gmra.mrb[4].mxu0 %vm51_vm1, %v31_v52 }
  0x27   :  { %1185 = vmatprep.mubr.msk.f32.mxu0 %vm51_vm1, %v32_v53 }
  0x2a   :  { %1186 = vmatmul.mubr.msk.f32.gmra.mrb[6].mxu0 %vm51_vm1, %v33_v54 }
  0x2b   :  { %1218 = vmatprep.mubr.msk.f32.mxu0 %vm1474_vm0, %v1475_v1 }
  0xf0   :  { %v1178_v15 = vpop.f32.mrb[0].mxu0 }
  0xf1   :  { %v142_v16 = vpop.f32.mrb[1].mxu0  ;;  %v148_v35 = vadd.f32 %v1178_v15, %v1537_v14 }
  0xf2   :  { %v143_v17 = vadd.f32 %v1537_v14, %v142_v16  ;;  %v251_v18 = vpop.f32.mrb[0].mxu1 }
  0xf3   :  { %v1198_v19 = vpop.f32.mrb[1].mxu1 }
  0xf4   :  { %v255_v20 = vadd.f32 %v251_v18, %v143_v17 }
  0xf5   :  { %v1181_v58 = vpop.f32.mrb[2].mxu0 }
  0xf6   :  { %1354 = vtanh.f32 %v255_v20  ;;  %v1097_v22 = vmul.f32 -1.442695, %v255_v20  ;;  %v152_v59 = vpop.f32.mrb[3].mxu0 }
  0xf7   :  { %v153_v3 = vadd.f32 %v1537_v14, %v152_v59 }
  0xf8   :  { %1356 = vpow2.f32 %v1097_v22 }
  0xf9   :  { %v1582_v60 = vpop.f32.mrb[4].mxu0 }
  0xfa   :  { %v1584_v61 = vpop.f32.mrb[5].mxu0 }
  0xfd   :  { %v1586_v62 = vpop.f32.mrb[6].mxu0 }
  0xfe   :  { %v1588_v63 = vpop.f32.mrb[7].mxu0 }
 0x100   :  { %v1355_v21 = vpop.eup %1354 }
 0x101   :  { %265 = vrot.lane.b32.xlu0 %v1355_v21, %s1476_s26 }
 0x102   :  { %v1357_v23 = vpop.eup %1356 }
 0x103   :  { %v259_v24 = vadd.f32 1.0, %v1357_v23 }
 0x105   :  { %1358 = vrcp.f32 %v259_v24  ;;  %v158_v24 = vadd.f32 %v1181_v58, %v1537_v14 }
 0x10f   :  { %v1359_v25 = vpop.eup %1358 }
 0x110   :  { %v263_v28 = vmul.f32 0.0, %v1359_v25 }
 0x173   :  { %v266_v26 = vpop.permute.xlu0 %265 }
 0x174   :  { %v268_v27 = vmul.f32 %v1359_v25, %v266_v26 }
 0x176   :  { %270 = vrot.lane.b32.xlu0 %v268_v27, %s1477_s27 }
 0x1e8   :  { %v271_v29 = vpop.permute.xlu0 %270 }
 0x1e9   :  { %v273_v30 = vadd.f32 %v271_v29, %v263_v28 }
 0x1eb   :  { %1360 = vtanh.f32 %v273_v30 }
 0x1f5   :  { %v1361_v31 = vpop.eup %1360 }
 0x1f6   :  { %276 = vrot.lane.b32.xlu1 %v1361_v31, %s1476_s26 }
 0x268   :  { %v277_v32 = vpop.permute.xlu1 %276 }
 0x269   :  { %v279_v33 = vmul.f32 %v1359_v25, %v277_v32 }
 0x26b   :  { %281 = vrot.lane.b32.xlu1 %v279_v33, %s1477_s27 }
 0x2dd   :  { %v282_v34 = vpop.permute.xlu1 %281 }
 0x2de   :  { %1208 = vmatmul.mubr.msk.f32.vlgmr.msra.gmra.mrb[2].mxu1 %vm181_vm2, %v282_v34 }
 0x2df   :  { %1311 = vmatpush3.bf16.msra.mxu1 %v1512_v8  ;;  %1229 = vmatprep.mubr.msk.f32.mxu1 %vm1474_vm0, %v1475_v1 }
 0x2e0   :  { %1312 = vmatprep.subr.bf16.mxu1 %v1473_v0 }
 0x2e3   :  { %1314 = vmatpush3.bf16.msra.mxu1 %v1516_v12 }
 0x2e4   :  { %1321 = vmatprep.subr.bf16.mxu1 %v1473_v0 }
 0x3b1   :  { %v351_v36 = vpop.f32.mrb[2].mxu1 }
 0x3b2   :  { %v355_v37 = vadd.f32 %v351_v36, %v148_v35  ;;  %v1209_v38 = vpop.f32.mrb[3].mxu1 }
 0x3b4   :  { %1362 = vtanh.f32 %v355_v37  ;;  %v1099_v40 = vmul.f32 -1.442695, %v355_v37 }
 0x3b6   :  { %1364 = vpow2.f32 %v1099_v40 }
 0x3be   :  { %v1363_v39 = vpop.eup %1362 }
 0x3bf   :  { %365 = vrot.lane.b32.xlu0 %v1363_v39, %s1476_s26 }
 0x3c0   :  { %v1365_v41 = vpop.eup %1364 }
 0x3c1   :  { %v359_v42 = vadd.f32 1.0, %v1365_v41 }
 0x3c3   :  { %1366 = vrcp.f32 %v359_v42  ;;  %v163_v42 = vadd.f32 %v1537_v14, %v1584_v61  ;;  %v168_v61 = vadd.f32 %v1582_v60, %v1537_v14 }
 0x3cd   :  { %v1367_v43 = vpop.eup %1366 }
 0x3ce   :  { %v363_v46 = vmul.f32 %v1367_v43, %v273_v30 }
 0x431   :  { %v366_v44 = vpop.permute.xlu0 %365 }
 0x432   :  { %v368_v45 = vmul.f32 %v1367_v43, %v366_v44 }
 0x434   :  { %370 = vrot.lane.b32.xlu1 %v368_v45, %s1477_s27 }
 0x4a6   :  { %v371_v47 = vpop.permute.xlu1 %370 }
 0x4a7   :  { %v373_v48 = vadd.f32 %v371_v47, %v363_v46 }
 0x4a9   :  { %1368 = vtanh.f32 %v373_v48 }
 0x4b3   :  { %v1369_v55 = vpop.eup %1368 }
 0x4b4   :  { %376 = vrot.lane.b32.xlu0 %v1369_v55, %s1476_s26 }
 0x526   :  { %v377_v56 = vpop.permute.xlu0 %376 }
 0x527   :  { %v379_v57 = vmul.f32 %v1367_v43, %v377_v56 }
 0x529   :  { %381 = vrot.lane.b32.xlu1 %v379_v57, %s1477_s27 }
 0x59b   :  { %v382_v2 = vpop.permute.xlu1 %381 }
 0x59c   :  { %1219 = vmatmul.mubr.msk.f32.vlgmr.msra.gmra.mrb[8].mxu0 %vm181_vm2, %v382_v2 }
 0x59d   :  { %1317 = vmatpush3.bf16.msra.mxu0 %v1512_v8  ;;  %1240 = vmatprep.mubr.msk.f32.mxu0 %vm1474_vm0, %v1475_v1 }
 0x59e   :  { %1318 = vmatprep.subr.bf16.mxu0 %v1473_v0 }
 0x5a1   :  { %1320 = vmatpush3.bf16.msra.mxu0 %v1516_v12 }
 0x5a2   :  { %1327 = vmatprep.subr.bf16.mxu0 %v1473_v0 }
 0x66f   :  { %v451_v4 = vpop.f32.mrb[8].mxu0 }
 0x670   :  { %v455_v5 = vadd.f32 %v451_v4, %v153_v3  ;;  %v1220_v6 = vpop.f32.mrb[9].mxu0 }
 0x672   :  { %1370 = vtanh.f32 %v455_v5  ;;  %v1101_v9 = vmul.f32 -1.442695, %v455_v5 }
 0x674   :  { %1372 = vpow2.f32 %v1101_v9 }
 0x67c   :  { %v1371_v7 = vpop.eup %1370 }
 0x67d   :  { %465 = vrot.lane.b32.xlu0 %v1371_v7, %s1476_s26 }
 0x67e   :  { %v1373_v10 = vpop.eup %1372 }
 0x67f   :  { %v459_v11 = vadd.f32 1.0, %v1373_v10 }
 0x681   :  { %1374 = vrcp.f32 %v459_v11 }
 0x68b   :  { %v1375_v13 = vpop.eup %1374 }
 0x68c   :  { %v463_v17 = vmul.f32 %v1375_v13, %v373_v48 }
 0x6ef   :  { %v466_v15 = vpop.permute.xlu0 %465 }
 0x6f0   :  { %v468_v16 = vmul.f32 %v1375_v13, %v466_v15 }
 0x6f2   :  { %470 = vrot.lane.b32.xlu1 %v468_v16, %s1477_s27 }
 0x764   :  { %v471_v18 = vpop.permute.xlu1 %470 }
 0x765   :  { %v473_v19 = vadd.f32 %v471_v18, %v463_v17 }
 0x767   :  { %1376 = vtanh.f32 %v473_v19 }
 0x771   :  { %v1377_v20 = vpop.eup %1376 }
 0x772   :  { %476 = vrot.lane.b32.xlu0 %v1377_v20, %s1476_s26 }
 0x7e4   :  { %v477_v21 = vpop.permute.xlu0 %476 }
 0x7e5   :  { %v479_v22 = vmul.f32 %v1375_v13, %v477_v21 }
 0x7e7   :  { %481 = vrot.lane.b32.xlu1 %v479_v22, %s1477_s27 }
 0x859   :  { %v482_v23 = vpop.permute.xlu1 %481 }
 0x85a   :  { %1230 = vmatmul.mubr.msk.f32.vlgmr.msra.gmra.mrb[4].mxu1 %vm181_vm2, %v482_v23 }
 0x85b   :  { %1323 = vmatpush3.bf16.msra.mxu1 %v1512_v8  ;;  %1251 = vmatprep.mubr.msk.f32.mxu1 %vm1474_vm0, %v1475_v1 }
 0x85c   :  { %1324 = vmatprep.subr.bf16.mxu1 %v1473_v0 }
 0x85f   :  { %1326 = vmatpush3.bf16.msra.mxu1 %v1516_v12 }
 0x860   :  { %1333 = vmatprep.subr.bf16.mxu1 %v1473_v0 }
 0x92d   :  { %v551_v25 = vpop.f32.mrb[4].mxu1 }
 0x92e   :  { %v555_v26 = vadd.f32 %v551_v25, %v158_v24  ;;  %v1231_v27 = vpop.f32.mrb[5].mxu1 }
 0x930   :  { %1378 = vtanh.f32 %v555_v26  ;;  %v1103_v29 = vmul.f32 -1.442695, %v555_v26 }
 0x932   :  { %1380 = vpow2.f32 %v1103_v29 }
 0x93a   :  { %v1379_v28 = vpop.eup %1378 }
 0x93b   :  { %565 = vrot.lane.b32.xlu0 %v1379_v28, %s1476_s26 }
 0x93c   :  { %v1381_v30 = vpop.eup %1380 }
 0x93d   :  { %v559_v31 = vadd.f32 1.0, %v1381_v30 }
 0x93f   :  { %1382 = vrcp.f32 %v559_v31 }
 0x949   :  { %v1383_v32 = vpop.eup %1382 }
 0x94a   :  { %v563_v35 = vmul.f32 %v1383_v32, %v473_v19  ;;  %v173_v19 = vadd.f32 %v1537_v14, %v1588_v63 }
 0x9ad   :  { %v566_v33 = vpop.permute.xlu0 %565 }
 0x9ae   :  { %v568_v34 = vmul.f32 %v1383_v32, %v566_v33 }
 0x9b0   :  { %570 = vrot.lane.b32.xlu1 %v568_v34, %s1477_s27 }
 0xa22   :  { %v571_v36 = vpop.permute.xlu1 %570 }
 0xa23   :  { %v573_v37 = vadd.f32 %v571_v36, %v563_v35  ;;  %v178_v35 = vadd.f32 %v1586_v62, %v1537_v14  ;;  %v41_v62 = vld [vmem:[#allocation2 + $0x38] sm:$0xff] }
 0xa25   :  { %1384 = vtanh.f32 %v573_v37 }
 0xa2f   :  { %v1385_v38 = vpop.eup %1384 }
 0xa30   :  { %576 = vrot.lane.b32.xlu0 %v1385_v38, %s1476_s26 }
 0xaa2   :  { %v577_v39 = vpop.permute.xlu0 %576 }
 0xaa3   :  { %v579_v40 = vmul.f32 %v1383_v32, %v577_v39 }
 0xaa5   :  { %581 = vrot.lane.b32.xlu1 %v579_v40, %s1477_s27 }
 0xb17   :  { %v582_v41 = vpop.permute.xlu1 %581 }
 0xb18   :  { %1241 = vmatmul.mubr.msk.f32.vlgmr.msra.gmra.mrb[10].mxu0 %vm181_vm2, %v582_v41 }
 0xb19   :  { %1329 = vmatpush3.bf16.msra.mxu0 %v1512_v8  ;;  %1262 = vmatprep.mubr.msk.f32.mxu0 %vm1474_vm0, %v1475_v1 }
 0xb1a   :  { %1330 = vmatprep.subr.bf16.mxu0 %v1473_v0 }
 0xb1d   :  { %1332 = vmatpush3.bf16.msra.mxu0 %v1516_v12 }
 0xb1e   :  { %1339 = vmatprep.subr.bf16.mxu0 %v1473_v0 }
 0xbeb   :  { %v651_v43 = vpop.f32.mrb[10].mxu0 }
 0xbec   :  { %v655_v44 = vadd.f32 %v651_v43, %v163_v42  ;;  %v1242_v45 = vpop.f32.mrb[11].mxu0 }
 0xbee   :  { %1386 = vtanh.f32 %v655_v44  ;;  %v1105_v47 = vmul.f32 -1.442695, %v655_v44 }
 0xbf0   :  { %1388 = vpow2.f32 %v1105_v47 }
 0xbf8   :  { %v1387_v46 = vpop.eup %1386 }
 0xbf9   :  { %665 = vrot.lane.b32.xlu0 %v1387_v46, %s1476_s26 }
 0xbfa   :  { %v1389_v48 = vpop.eup %1388 }
 0xbfb   :  { %v659_v49 = vadd.f32 1.0, %v1389_v48  ;;  %v42_v48 = vld [vmem:[#allocation2 + $0x40] sm:$0xff] }
 0xbfd   :  { %1390 = vrcp.f32 %v659_v49  ;;  %v43_v49 = vld [vmem:[#allocation2 + $0x48] sm:$0xff] }
 0xc07   :  { %v1391_v50 = vpop.eup %1390 }
 0xc08   :  { %v663_v53 = vmul.f32 %v1391_v50, %v573_v37 }
 0xc6b   :  { %v666_v51 = vpop.permute.xlu0 %665 }
 0xc6c   :  { %v668_v52 = vmul.f32 %v1391_v50, %v666_v51  ;;  %v44_v51 = vld [vmem:[#allocation2 + $0x50] sm:$0xff] }
 0xc6e   :  { %670 = vrot.lane.b32.xlu1 %v668_v52, %s1477_s27  ;;  %v1343_v52 = vpack.c.bf16 %v44_v51, %v43_v49 }
 0xce0   :  { %v671_v54 = vpop.permute.xlu1 %670 }
 0xce1   :  { %v673_v55 = vadd.f32 %v671_v54, %v663_v53 }
 0xce3   :  { %1392 = vtanh.f32 %v673_v55 }
 0xced   :  { %v1393_v56 = vpop.eup %1392 }
 0xcee   :  { %676 = vrot.lane.b32.xlu0 %v1393_v56, %s1476_s26 }
 0xd60   :  { %v677_v57 = vpop.permute.xlu0 %676 }
 0xd61   :  { %v679_v58 = vmul.f32 %v1391_v50, %v677_v57  ;;  %v1340_v50 = vpack.c.bf16 %v42_v48, %v41_v62  ;;  %v1059_v57 = vlaneseq }
 0xd63   :  { %681 = vrot.lane.b32.xlu1 %v679_v58, %s1477_s27  ;;  %v1060_v58 = vand.u32 127, %v1059_v57 }
 0xd65   :  { %vm1061_vm3 = vcmp.lt.s32.totalorder %v1060_v58, 10 }
 0xdd5   :  { %v682_v59 = vpop.permute.xlu1 %681 }
 0xdd6   :  { %1252 = vmatmul.mubr.msk.f32.vlgmr.msra.gmra.mrb[6].mxu1 %vm181_vm2, %v682_v59  ;;  %v1112_v59 = vld [vmem:[#allocation2 + $0x59] ss:$0 sm:$0xff] }
 0xdd7   :  { %1335 = vmatpush3.bf16.msra.mxu1 %v1512_v8  ;;  %1273 = vmatprep.mubr.msk.f32.mxu1 %vm1474_vm0, %v1475_v1 }
 0xdd8   :  { %1336 = vmatprep.subr.bf16.mxu1 %v1473_v0 }
 0xddb   :  { %1338 = vmatpush3.bf16.msra.mxu1 %v1516_v12 }
 0xea9   :  { %v751_v2 = vpop.f32.mrb[6].mxu1 }
 0xeaa   :  { %v755_v3 = vadd.f32 %v751_v2, %v168_v61  ;;  %v1253_v4 = vpop.f32.mrb[7].mxu1 }
 0xeac   :  { %1394 = vtanh.f32 %v755_v3  ;;  %v1107_v6 = vmul.f32 -1.442695, %v755_v3 }
 0xeae   :  { %1396 = vpow2.f32 %v1107_v6 }
 0xeb6   :  { %v1395_v5 = vpop.eup %1394 }
 0xeb7   :  { %765 = vrot.lane.b32.xlu0 %v1395_v5, %s1476_s26 }
 0xeb8   :  { %v1397_v8 = vpop.eup %1396 }
 0xeb9   :  { %v759_v7 = vadd.f32 1.0, %v1397_v8 }
 0xebb   :  { %1398 = vrcp.f32 %v759_v7 }
 0xec5   :  { %v1399_v9 = vpop.eup %1398 }
 0xec6   :  { %v763_v12 = vmul.f32 %v1399_v9, %v673_v55 }
 0xf29   :  { %v766_v10 = vpop.permute.xlu0 %765 }
 0xf2a   :  { %v768_v11 = vmul.f32 %v1399_v9, %v766_v10 }
 0xf2c   :  { %770 = vrot.lane.b32.xlu1 %v768_v11, %s1477_s27 }
 0xf9e   :  { %v771_v13 = vpop.permute.xlu1 %770 }
 0xf9f   :  { %v773_v60 = vadd.f32 %v771_v13, %v763_v12 }
 0xfa1   :  { %1400 = vtanh.f32 %v773_v60 }
 0xfab   :  { %v1401_v15 = vpop.eup %1400 }
 0xfac   :  { %776 = vrot.lane.b32.xlu0 %v1401_v15, %s1476_s26 }
0x101e   :  { %v777_v16 = vpop.permute.xlu0 %776 }
0x101f   :  { %v779_v17 = vmul.f32 %v1399_v9, %v777_v16 }
0x1021   :  { %781 = vrot.lane.b32.xlu1 %v779_v17, %s1477_s27 }
0x1093   :  { %v782_v18 = vpop.permute.xlu1 %781 }
0x1094   :  { %1263 = vmatmul.mubr.msk.f32.vlgmr.msra.gmra.mrb[12].mxu0 %vm181_vm2, %v782_v18 }
0x1095   :  { %1284 = vmatprep.mubr.msk.f32.mxu0 %vm1474_vm0, %v1475_v1  ;;  %1341 = vmatpush3.bf16.msra.mxu0 %v1340_v50 }
0x1096   :  { %1342 = vmatprep.subr.bf16.mxu0 %v1473_v0 }
0x1099   :  { %1344 = vmatpush3.bf16.msra.mxu0 %v1343_v52 }
0x1167   :  { %v851_v20 = vpop.f32.mrb[12].mxu0 }
0x1168   :  { %v855_v21 = vadd.f32 %v851_v20, %v173_v19  ;;  %v1264_v22 = vpop.f32.mrb[13].mxu0 }
0x116a   :  { %1402 = vtanh.f32 %v855_v21  ;;  %v1109_v24 = vmul.f32 -1.442695, %v855_v21 }
0x116c   :  { %1404 = vpow2.f32 %v1109_v24 }
0x1174   :  { %v1403_v23 = vpop.eup %1402 }
0x1175   :  { %865 = vrot.lane.b32.xlu0 %v1403_v23, %s1476_s26 }
0x1176   :  { %v1405_v25 = vpop.eup %1404 }
0x1177   :  { %v859_v26 = vadd.f32 1.0, %v1405_v25 }
0x1179   :  { %1406 = vrcp.f32 %v859_v26 }
0x1183   :  { %v1407_v27 = vpop.eup %1406 }
0x1184   :  { %v863_v1 = vmul.f32 %v1407_v27, %v773_v60 }
0x11e7   :  { %v866_v28 = vpop.permute.xlu0 %865 }
0x11e8   :  { %v868_v29 = vmul.f32 %v1407_v27, %v866_v28 }
0x11ea   :  { %870 = vrot.lane.b32.xlu1 %v868_v29, %s1477_s27 }
0x125c   :  { %v871_v30 = vpop.permute.xlu1 %870 }
0x125d   :  { %v873_v63 = vadd.f32 %v871_v30, %v863_v1 }
0x125f   :  { %1408 = vtanh.f32 %v873_v63 }
0x1269   :  { %v1409_v31 = vpop.eup %1408 }
0x126a   :  { %876 = vrot.lane.b32.xlu0 %v1409_v31, %s1476_s26 }
0x12dc   :  { %v877_v32 = vpop.permute.xlu0 %876 }
0x12dd   :  { %v879_v33 = vmul.f32 %v1407_v27, %v877_v32 }
0x12df   :  { %881 = vrot.lane.b32.xlu1 %v879_v33, %s1477_s27 }
0x1351   :  { %v882_v34 = vpop.permute.xlu1 %881 }
0x1352   :  { %1274 = vmatmul.mubr.msk.f32.vlgmr.msra.gmra.mrb[8].mxu1 %vm181_vm2, %v882_v34 }
0x1425   :  { %v951_v36 = vpop.f32.mrb[8].mxu1 }
0x1426   :  { %v955_v37 = vadd.f32 %v951_v36, %v178_v35  ;;  %v1275_v38 = vpop.f32.mrb[9].mxu1 }
0x1428   :  { %1410 = vtanh.f32 %v955_v37  ;;  %v1111_v40 = vmul.f32 -1.442695, %v955_v37 }
0x142a   :  { %1412 = vpow2.f32 %v1111_v40 }
0x1432   :  { %v1411_v39 = vpop.eup %1410 }
0x1433   :  { %965 = vrot.lane.b32.xlu0 %v1411_v39, %s1476_s26 }
0x1434   :  { %v1413_v41 = vpop.eup %1412 }
0x1435   :  { %v959_v42 = vadd.f32 1.0, %v1413_v41 }
0x1437   :  { %1414 = vrcp.f32 %v959_v42 }
0x1441   :  { %v1415_v43 = vpop.eup %1414 }
0x1442   :  { %v963_v46 = vmul.f32 %v1415_v43, %v873_v63 }
0x14a5   :  { %v966_v44 = vpop.permute.xlu0 %965 }
0x14a6   :  { %v968_v45 = vmul.f32 %v1415_v43, %v966_v44 }
0x14a8   :  { %970 = vrot.lane.b32.xlu1 %v968_v45, %s1477_s27 }
0x151a   :  { %v971_v47 = vpop.permute.xlu1 %970 }
0x151b   :  { %v973_v14 = vadd.f32 %v971_v47, %v963_v46 }
0x151d   :  { %1416 = vtanh.f32 %v973_v14 }
0x1527   :  { %v1417_v53 = vpop.eup %1416 }
0x1528   :  { %976 = vrot.lane.b32.xlu0 %v1417_v53, %s1476_s26 }
0x159a   :  { %v977_v54 = vpop.permute.xlu0 %976 }
0x159b   :  { %v979_v55 = vmul.f32 %v1415_v43, %v977_v54 }
0x159d   :  { %985 = vrot.lane.b32.xlu1 %v979_v55, %s1477_s27 }
0x160f   :  { %v986_v56 = vpop.permute.xlu1 %985 }
0x1610   :  { %1285 = vmatmul.mubr.msk.f32.vlgmr.msra.gmra.mrb[14].mxu0 %vm181_vm2, %v986_v56 }
0x16e3   :  { %v1055_v61 = vpop.f32.mrb[14].mxu0 }
0x16e4   :  { %v1056_v2 = vadd.f32 %v1112_v59, %v1055_v61  ;;  %v1286_v3 = vpop.f32.mrb[15].mxu0 }
0x16e6   :  { %v1062_v4 = vsel %vm1061_vm3, %v1056_v2, -inf }
0x16e7   :  { %1063 = vmax.xlane.f32.xlu0 %v1062_v4 }
0x1774   :  { %v1064_v0 = vpop.xlane.xlu0 %1063 }
0x1775   :  { %v1065_v5 = vsub.f32 %v1062_v4, %v1064_v0 }
0x1777   :  { %v1066_v6 = vmul.f32 1.442695, %v1065_v5 }
0x1779   :  { %1418 = vpow2.f32 %v1066_v6 }
0x1783   :  { %v1419_v8 = vpop.eup %1418 }
0x1784   :  { %1068 = vadd.xlane.f32.xlu1 %v1419_v8 }
0x1811   :  { %v1069_v7 = vpop.xlane.xlu1 %1068 }
0x1812   :  { %1420 = vrcp.f32 %v1069_v7 }
0x181c   :  { %v1421_v9 = vpop.eup %1420 }
0x181d   :  { %v1071_v10 = vmul.f32 %v1421_v9, %v1419_v8 }
0x181f   :  { %1072 = vst [vmem:[#allocation5] sm:$0xff] %v1071_v10 }
0x1820   :  { %1455 = shalt.err (!%p1452_p12)
}
0x1821   :  { %s1456_s16 = scalar_lea.hbm %s1671_s2, 128 }
0x1822   :  { %p1457_p13 = scmp.ne.s32.totalorder %s1671_s2, %s1456_s16  ;;  %p1460_p0 = scmp.lt.u32.totalorder %s1456_s16, %s1671_s2 }
0x1824   :  { %p1462_p1 = pnand %p1460_p0, %p1457_p13 }
0x1826   :  { %1465 = shalt.err (!%p1462_p1)
}
0x1827   :  { %1082 = dma.vmem_to_hbm [thread:$0]  %s1080_s12, 128, %s1671_s2, [#allocation4]  }
0x1828   :  { %1468 = dma.done.wait [#allocation4], 128  }
0x1829   :  { %1469 = vsyncadd [#allocation4], 4294967168 }
0x182a   :  { %1086 = vsyncpa [#allocation3], 1 }
0x182b   :  { %1087 = vsyncpa [#allocation4], 1 }

</bundles_post_ra>
